<compile_context>
chip_gen: v7x
topology: tpu7x:2x2x1
jax: 0.10.0
libtpu: 0.0.40
codegen_flags: <defaults>
</compile_context>

<pallas_src>
import jax
import jax.numpy as jnp
from jax.experimental import pallas as pl
from jax.experimental.pallas import tpu as pltpu


def _ffn_kernel(x_ref, w1_ref, b1_ref, w2_ref, b2_ref, o_ref):
    # x_ref: (TM, Dp), w1_ref: (Dp, Hp), b1_ref: (1, Hp),
    # w2_ref: (Hp, Dp), b2_ref: (1, Dp), o_ref: (TM, Dp)
    x = x_ref[...]  # native dtype (bf16 stays bf16 for the MXU fast path)
    h = jnp.dot(x, w1_ref[...], preferred_element_type=jnp.float32)
    h = h + b1_ref[...].astype(jnp.float32)
    h = jnp.maximum(h, 0.0)  # ReLU (f32 epilogue; safe on v5e which lacks bf16 VPU)
    y = jnp.dot(h.astype(w2_ref.dtype), w2_ref[...],
                preferred_element_type=jnp.float32)
    y = y + b2_ref[...].astype(jnp.float32)
    # Residual uses the SAME row tile of x (identical index_map as the output).
    o_ref[...] = (y + x.astype(jnp.float32)).astype(o_ref.dtype)


def pack_ffn_weights(w1, b1, w2, b2, compute_dtype=None):
    """Pack FFN weights once (call OUTSIDE the per-forward hot path).

    Lane packing: when D divides 128, `pack = 128 // D` logical rows are folded
    into one lane-dense 128-wide row using block-diagonal weights -> full
    128-lane vregs and unmasked stores inside the kernel.
    """
    D, H = w1.shape
    pack = 128 // D if (D < 128 and 128 % D == 0) else 1
    if compute_dtype is not None:
        w1 = w1.astype(compute_dtype)
        w2 = w2.astype(compute_dtype)
    if pack > 1:
        eye1 = jnp.eye(pack, dtype=w1.dtype)
        eye2 = jnp.eye(pack, dtype=w2.dtype)
        w1p = jnp.einsum("pq,dh->pdqh", eye1, w1).reshape(pack * D, pack * H)
        w2p = jnp.einsum("pq,hd->phqd", eye2, w2).reshape(pack * H, pack * D)
        b1p = jnp.tile(b1, pack)
        b2p = jnp.tile(b2, pack)
    else:
        w1p, w2p, b1p, b2p = w1, w2, b1, b2
    b1p = b1p.reshape(1, pack * H).astype(jnp.float32)
    b2p = b2p.reshape(1, pack * D).astype(jnp.float32)
    return dict(pack=pack, D=D, H=H, w1=w1p, b1=b1p, w2=w2p, b2=b2p)


def pointwise_feedforward(x, packed, *, tm_target=1024):
    """x: (B, L, D); packed: output of pack_ffn_weights."""
    B, L, D = x.shape
    assert D == packed["D"], "feature dim mismatch vs packed weights"
    pack, H = packed["pack"], packed["H"]
    N = B * L
    out_dtype = x.dtype
    Dp, Hp = pack * D, pack * H

    # ---- lane packing reshape (free, row-major metadata) --------------------
    padded = (N % pack) != 0
    if padded:
        # Rare fallback: N not divisible by the pack factor -> tiny host pad.
        # (Costs one extra activation copy; typical SASRec B*L is divisible.)
        n_pad = pack - (N % pack)
        xp = jnp.pad(x.reshape(N, D), ((0, n_pad), (0, 0)))
        Np = (N + n_pad) // pack
        xp = xp.reshape(Np, Dp)
    else:
        Np = N // pack
        xp = x.reshape(Np, Dp)

    # ---- balanced row tiling (post-packing) ----------------------------------
    num_tiles = pl.cdiv(Np, tm_target)
    if num_tiles == 1 and Np >= 16:
        num_tiles = 2  # >=2 grid steps so the parallel axis shards across v7x TCs
    if num_tiles > 1:
        TM = ((pl.cdiv(Np, num_tiles) + 7) // 8) * 8  # (8,128) rule on row dim
    else:
        TM = Np  # single block == full dim: always a legal block shape
    grid_m = pl.cdiv(Np, TM)
    # Ragged last tile (Np % TM != 0) is handled by Pallas (clamped DMA reads,
    # masked writeback) -> no host-side pad/slice of the row axis.

    w1p, b1p, w2p, b2p = packed["w1"], packed["b1"], packed["w2"], packed["b2"]
    w_bytes = ((w1p.size + w2p.size) * jnp.dtype(w1p.dtype).itemsize
               + (b1p.size + b2p.size) * 4)
    x_bytes = N * D * jnp.dtype(out_dtype).itemsize

    cost = pl.CostEstimate(
        flops=4 * N * D * H,          # useful work only (2 matmuls)
        transcendentals=0,
        bytes_accessed=2 * x_bytes + w_bytes,
    )

    # ---- VMEM budget (x/out double-buffered tiles + weights + f32 temps) -----
    itemsize = jnp.dtype(out_dtype).itemsize
    vmem_need = (2 * 2 * TM * Dp * itemsize   # x in + out, double-buffered
                 + 2 * w_bytes                # weights (default double-buffer)
                 + TM * (Hp + Dp) * 4)        # f32 intermediates h / y
    vmem_limit = int(min(max(2 * vmem_need, 32 * 1024 * 1024),
                         64 * 1024 * 1024))   # <= physical VMEM on all gens

    outp = pl.pallas_call(
        _ffn_kernel,
        out_shape=jax.ShapeDtypeStruct((Np, Dp), out_dtype),
        grid_spec=pltpu.PrefetchScalarGridSpec(
            num_scalar_prefetch=0,
            grid=(grid_m,),
            in_specs=[
                pl.BlockSpec((TM, Dp), lambda i: (i, 0)),   # x tile (pipelined)
                # Weights/biases: constant index_map -> fetched once, VMEM-resident.
                pl.BlockSpec((Dp, Hp), lambda i: (0, 0)),   # w1
                pl.BlockSpec((1, Hp),  lambda i: (0, 0)),   # b1
                pl.BlockSpec((Hp, Dp), lambda i: (0, 0)),   # w2
                pl.BlockSpec((1, Dp),  lambda i: (0, 0)),   # b2
            ],
            out_specs=pl.BlockSpec((TM, Dp), lambda i: (i, 0)),
        ),
        compiler_params=pltpu.CompilerParams(
            dimension_semantics=("parallel",),
            vmem_limit_bytes=vmem_limit),
        cost_estimate=cost,
    )(xp, w1p, b1p, w2p, b2p)

    if padded:
        return outp.reshape(-1, D)[:N].reshape(B, L, D)
    return outp.reshape(B, L, D)


def _ref_ffn(x, w1, b1, w2, b2):
    h = jnp.maximum(jnp.einsum("bld,dh->blh", x, w1) + b1, 0.0)
    y = jnp.einsum("blh,hd->bld", h, w2) + b2
    return y + x


if __name__ == "__main__":
    B, L, D, H = 2, 8, 32, 64  # batch, seq, input_size, hidden_size

    key = jax.random.PRNGKey(0)
    kx, kw1, kb1, kw2, kb2 = jax.random.split(key, 5)

    x = jax.random.normal(kx, (B, L, D), dtype=jnp.float32)
    # Deterministic init mimicking nn.Linear's uniform(-1/sqrt(fan_in), 1/sqrt(fan_in))
    lim1 = 1.0 / (D ** 0.5)
    lim2 = 1.0 / (H ** 0.5)
    w1 = jax.random.uniform(kw1, (D, H), jnp.float32, -lim1, lim1)
    b1 = jax.random.uniform(kb1, (H,), jnp.float32, -lim1, lim1)
    w2 = jax.random.uniform(kw2, (H, D), jnp.float32, -lim2, lim2)
    b2 = jax.random.uniform(kb2, (D,), jnp.float32, -lim2, lim2)

    # Pack once (outside the hot path), then run the kernel.
    packed = pack_ffn_weights(w1, b1, w2, b2)
    out = pointwise_feedforward(x, packed)
    out = jax.block_until_ready(out)

    ref = _ref_ffn(x, w1, b1, w2, b2)
    assert out.shape == (B, L, D)
    assert jnp.allclose(out, ref, atol=1e-5, rtol=1e-5), "mismatch vs reference"
    print("KERNEL_OK")
</pallas_src>

<mosaic_0001>
module attributes {stable_mosaic.version = 11 : i64} {
  func.func @_ffn_kernel(%arg0: i32, %arg1: memref<4x128xf32, #tpu.memory_space<vmem>>, %arg2: memref<128x256xf32, #tpu.memory_space<vmem>>, %arg3: memref<1x256xf32, #tpu.memory_space<vmem>>, %arg4: memref<256x128xf32, #tpu.memory_space<vmem>>, %arg5: memref<1x128xf32, #tpu.memory_space<vmem>>, %arg6: memref<4x128xf32, #tpu.memory_space<vmem>>) attributes {dimension_semantics = [#tpu.dimension_semantics<parallel>], iteration_bounds = array<i64: 1>, scalar_prefetch = 0 : i64, scratch_operands = 0 : i64, tpu.core_type = #tpu.core_type<tc>, window_params = [{transform_indices = @transform_0, window_bounds = array<i64: 4, 128>}, {pipeline_mode = #tpu.pipeline_mode<synchronous>, transform_indices = @transform_1, window_bounds = array<i64: 128, 256>}, {pipeline_mode = #tpu.pipeline_mode<synchronous>, transform_indices = @transform_2, window_bounds = array<i64: 1, 256>}, {pipeline_mode = #tpu.pipeline_mode<synchronous>, transform_indices = @transform_3, window_bounds = array<i64: 256, 128>}, {pipeline_mode = #tpu.pipeline_mode<synchronous>, transform_indices = @transform_4, window_bounds = array<i64: 1, 128>}, {transform_indices = @transform_5, window_bounds = array<i64: 4, 128>}]} {
    %c0 = arith.constant 0 : index
    %c0_0 = arith.constant 0 : index
    %0 = vector.load %arg1[%c0, %c0_0] : memref<4x128xf32, #tpu.memory_space<vmem>>, vector<4x128xf32>
    %c0_1 = arith.constant 0 : index
    %c0_2 = arith.constant 0 : index
    %1 = vector.load %arg2[%c0_1, %c0_2] : memref<128x256xf32, #tpu.memory_space<vmem>>, vector<128x256xf32>
    %cst = arith.constant dense<0.000000e+00> : vector<4x256xf32>
    %2 = tpu.matmul %0, %1, %cst {dimension_numbers = #tpu.dot_dimension_numbers<[1], [0], [0], [1], [0, 0, 1, 1], [], []>} : vector<4x128xf32>, vector<128x256xf32>, vector<4x256xf32> -> vector<4x256xf32>
    %c0_3 = arith.constant 0 : index
    %c0_4 = arith.constant 0 : index
    %3 = vector.load %arg3[%c0_3, %c0_4] : memref<1x256xf32, #tpu.memory_space<vmem>>, vector<1x256xf32>
    %4 = vector.broadcast %3 : vector<1x256xf32> to vector<4x256xf32>
    %5 = arith.addf %2, %4 : vector<4x256xf32>
    %cst_5 = arith.constant 0.000000e+00 : f32
    %6 = vector.broadcast %cst_5 : f32 to vector<4x256xf32>
    %7 = arith.maximumf %5, %6 : vector<4x256xf32>
    %c0_6 = arith.constant 0 : index
    %c0_7 = arith.constant 0 : index
    %8 = vector.load %arg4[%c0_6, %c0_7] : memref<256x128xf32, #tpu.memory_space<vmem>>, vector<256x128xf32>
    %cst_8 = arith.constant dense<0.000000e+00> : vector<4x128xf32>
    %9 = tpu.matmul %7, %8, %cst_8 {dimension_numbers = #tpu.dot_dimension_numbers<[1], [0], [0], [1], [0, 0, 1, 1], [], []>} : vector<4x256xf32>, vector<256x128xf32>, vector<4x128xf32> -> vector<4x128xf32>
    %c0_9 = arith.constant 0 : index
    %c0_10 = arith.constant 0 : index
    %10 = vector.load %arg5[%c0_9, %c0_10] : memref<1x128xf32, #tpu.memory_space<vmem>>, vector<1x128xf32>
    %11 = vector.broadcast %10 : vector<1x128xf32> to vector<4x128xf32>
    %12 = arith.addf %9, %11 : vector<4x128xf32>
    %13 = arith.addf %12, %0 : vector<4x128xf32>
    %c0_11 = arith.constant 0 : index
    %c0_12 = arith.constant 0 : index
    %14 = vector.load %arg6[%c0_11, %c0_12] : memref<4x128xf32, #tpu.memory_space<vmem>>, vector<4x128xf32>
    tpu.vector_store %arg6[%c0_11, %c0_12], %13 {strides = array<i32>} : memref<4x128xf32, #tpu.memory_space<vmem>>, vector<4x128xf32>,
    return
  }
  func.func @transform_0(%arg0: i32) -> (i32, i32) {
    %c0_i32 = arith.constant 0 : i32
    %c0_i32_0 = arith.constant 0 : i32
    return %arg0, %c0_i32 : i32, i32
  }
  func.func @transform_1(%arg0: i32) -> (i32, i32) {
    %c0_i32 = arith.constant 0 : i32
    %c0_i32_0 = arith.constant 0 : i32
    %c0_i32_1 = arith.constant 0 : i32
    return %c0_i32, %c0_i32_0 : i32, i32
  }
  func.func @transform_2(%arg0: i32) -> (i32, i32) {
    %c0_i32 = arith.constant 0 : i32
    %c0_i32_0 = arith.constant 0 : i32
    %c0_i32_1 = arith.constant 0 : i32
    return %c0_i32, %c0_i32_0 : i32, i32
  }
  func.func @transform_3(%arg0: i32) -> (i32, i32) {
    %c0_i32 = arith.constant 0 : i32
    %c0_i32_0 = arith.constant 0 : i32
    %c0_i32_1 = arith.constant 0 : i32
    return %c0_i32, %c0_i32_0 : i32, i32
  }
  func.func @transform_4(%arg0: i32) -> (i32, i32) {
    %c0_i32 = arith.constant 0 : i32
    %c0_i32_0 = arith.constant 0 : i32
    %c0_i32_1 = arith.constant 0 : i32
    return %c0_i32, %c0_i32_0 : i32, i32
  }
  func.func @transform_5(%arg0: i32) -> (i32, i32) {
    %c0_i32 = arith.constant 0 : i32
    %c0_i32_0 = arith.constant 0 : i32
    return %arg0, %c0_i32 : i32, i32
  }
}

</mosaic_0001>

<bundles_post_ra>
// kernel: tpu_custom_call.1
= control target key start
LH: loop header
LB: loop body
LE: loop exit
PB: predicated region body
PF: predicated region fallthrough
CT: control target
= control target key end

     0   :  { %10 = vsyncpa [#allocation3], 0  ;;  %s601_s0 = inlined_call_operand.hbm [shape: f32[4,128], index: 0, kind: input, shape index: {}]   ;;  %s602_s1 = inlined_call_operand.hbm [shape: f32[128,256], index: 1, kind: input, shape index: {}]   ;;  %s603_s2 = inlined_call_operand.vmem [shape: f32[1,256], index: 2, kind: input, shape index: {}]   ;;  %s604_s3 = inlined_call_operand.hbm [shape: f32[256,128], index: 3, kind: input, shape index: {}]   ;;  %s605_s4 = inlined_call_operand.vmem [shape: f32[1,128], index: 4, kind: input, shape index: {}]   ;;  %s606_s5 = inlined_call_operand.hbm [shape: f32[4,128], index: 5, kind: output, shape index: {}]  }
   0x1   :  { %11 = vsyncpa [#allocation6], 0 }
   0x2   :  { %12 = vsyncpa [#allocation4], 0  ;;  %s508_s18 = smov [#allocation5]   ;;  %s414_s22 = scalar_lea.hbm %s602_s1, 4096 }
   0x3   :  { %s28_s19 = sshll.u32 %s508_s18, 4  ;;  %p415_p0 = scmp.ne.s32.totalorder %s602_s1, %s414_s22  ;;  %s29_s19 = int_to_ptr.vmem [resolvable:$true] %s28_s19 }
   0x4   :  { %p418_p1 = scmp.lt.u32.totalorder %s414_s22, %s602_s1 }
   0x6   :  { %p420_p2 = pnand %p418_p1, %p415_p0 }
   0x8   :  { %423 = shalt.err (!%p420_p2)
}
   0x9   :  { %s424_s27 = scalar_lea.vmem %s29_s19, 4096  ;;  %p429_p4 = scmp.lt.s32.totalorder %s29_s19, %s29_s19 }
   0xa   :  { %p425_p3 = scmp.ne.s32.totalorder %s29_s19, %s424_s27  ;;  %p430_p5 = scmp.lt.s32.totalorder %s424_s27, %s424_s27 }
   0xc   :  { %p431_p6 = por %p430_p5, %p429_p4 }
   0xe   :  { %p432_p7 = pnand %p431_p6, %p425_p3 }
  0x10   :  { %435 = shalt.err (!%p432_p7)
}
  0x11   :  { %s509_s28 = smov 256   ;;  %s510_s29 = smov 16  }
  0x12   :  { %34 = dma.hbm_to_vmem [thread:$0]  %s602_s1, 4096, %s29_s19, [#allocation6], %s509_s28, %s509_s28, %s510_s29  }
  0x13   :  { %s511_s7 = smov [#allocation2]   ;;  %s512_s9 = smov [#allocation7]  }
  0x14   :  { %s19_s8 = sshll.u32 %s511_s7, 4  ;;  %s42_s10 = sshll.u32 %s512_s9, 4  ;;  %s20_s8 = int_to_ptr.vmem [resolvable:$true] %s19_s8  ;;  %s43_s10 = int_to_ptr.vmem [resolvable:$true] %s42_s10 }
  0x15   :  { %s436_s13 = scalar_lea.hbm %s601_s0, 64 }
  0x16   :  { %p437_p8 = scmp.ne.s32.totalorder %s601_s0, %s436_s13  ;;  %p440_p9 = scmp.lt.u32.totalorder %s436_s13, %s601_s0 }
  0x18   :  { %p442_p10 = pnand %p440_p9, %p437_p8 }
  0x1a   :  { %445 = shalt.err (!%p442_p10)
}
  0x1b   :  { %s446_s1 = scalar_lea.vmem %s20_s8, 64  ;;  %p451_p12 = scmp.lt.s32.totalorder %s20_s8, %s20_s8 }
  0x1c   :  { %p447_p11 = scmp.ne.s32.totalorder %s20_s8, %s446_s1  ;;  %p452_p13 = scmp.lt.s32.totalorder %s446_s1, %s446_s1 }
  0x1e   :  { %p453_p0 = por %p452_p13, %p451_p12 }
  0x20   :  { %p454_p1 = pnand %p453_p0, %p447_p11 }
  0x22   :  { %457 = shalt.err (!%p454_p1)
}
  0x23   :  { %22 = dma.hbm_to_vmem [thread:$0]  %s601_s0, 64, %s20_s8, [#allocation3]  }
  0x24   :  { %s458_s22 = scalar_lea.hbm %s604_s3, 4096 }
  0x25   :  { %p459_p2 = scmp.ne.s32.totalorder %s604_s3, %s458_s22  ;;  %p462_p3 = scmp.lt.u32.totalorder %s458_s22, %s604_s3 }
  0x27   :  { %p464_p4 = pnand %p462_p3, %p459_p2 }
  0x29   :  { %467 = shalt.err (!%p464_p4)
}
  0x2a   :  { %s468_s27 = scalar_lea.vmem %s43_s10, 4096  ;;  %p473_p6 = scmp.lt.s32.totalorder %s43_s10, %s43_s10 }
  0x2b   :  { %p469_p5 = scmp.ne.s32.totalorder %s43_s10, %s468_s27  ;;  %p474_p7 = scmp.lt.s32.totalorder %s468_s27, %s468_s27 }
  0x2d   :  { %p475_p8 = por %p474_p7, %p473_p6 }
  0x2f   :  { %p476_p9 = pnand %p475_p8, %p469_p5 }
  0x31   :  { %479 = shalt.err (!%p476_p9)
}
  0x32   :  { %s513_s0 = smov 128   ;;  %s514_s28 = smov 8  }
  0x33   :  { %48 = dma.hbm_to_vmem [thread:$0]  %s604_s3, 4096, %s43_s10, [#allocation6], %s513_s0, %s513_s0, %s514_s28  }
  0x34   :  { %502 = dma.done.wait [#allocation3], 64  }
  0x35   :  { %503 = vsyncadd [#allocation3], 4294967232 }
  0x36   :  { %504 = dma.done.wait [#allocation6], 8192  }
  0x37   :  { %505 = vsyncadd [#allocation6], 4294959104  ;;  %v515_v0 = vmov 0.0   ;;  %v62_v1 = vld [vmem:[#allocation5 + $0x8] sm:$0xff]  ;;  %v64_v2 = vld [vmem:[#allocation5 + $0x18] sm:$0xff]  ;;  %s516_s9 = smov [#allocation8]  }
  0x38   :  { %169 = vmatprep.mubr.f32.mxu0 %v515_v0  ;;  %v61_v3 = vld [vmem:[#allocation5] sm:$0xff]  ;;  %v341_v4 = vpack.c.bf16 %v64_v2, %v62_v1  ;;  %v63_v5 = vld [vmem:[#allocation5 + $0x10] sm:$0xff]  ;;  %v66_v6 = vld [vmem:[#allocation5 + $0x28] sm:$0xff] }
  0x39   :  { %v68_v7 = vld [vmem:[#allocation5 + $0x38] sm:$0xff]  ;;  %v343_v8 = vpack.c.bf16 %v63_v5, %v61_v3  ;;  %v65_v10 = vld [vmem:[#allocation5 + $0x20] sm:$0xff]  ;;  %v67_v11 = vld [vmem:[#allocation5 + $0x30] sm:$0xff] }
  0x3a   :  { %v345_v9 = vpack.c.bf16 %v68_v7, %v66_v6  ;;  %v70_v12 = vld [vmem:[#allocation5 + $0x48] sm:$0xff]  ;;  %342 = vmatprep.subr.bf16.mxu0 %v341_v4  ;;  %v72_v13 = vld [vmem:[#allocation5 + $0x58] sm:$0xff]  ;;  %v347_v14 = vpack.c.bf16 %v67_v11, %v65_v10  ;;  %v69_v16 = vld [vmem:[#allocation5 + $0x40] sm:$0xff] }
  0x3b   :  { %344 = vmatpush1.bf16.msra.mxu0 %v343_v8  ;;  %v349_v15 = vpack.c.bf16 %v72_v13, %v70_v12  ;;  %v71_v17 = vld [vmem:[#allocation5 + $0x50] sm:$0xff]  ;;  %v74_v18 = vld [vmem:[#allocation5 + $0x68] sm:$0xff]  ;;  %v76_v19 = vld [vmem:[#allocation5 + $0x78] sm:$0xff] }
  0x3c   :  { %346 = vmatprep.subr.bf16.mxu0 %v345_v9  ;;  %v351_v20 = vpack.c.bf16 %v71_v17, %v69_v16  ;;  %v353_v21 = vpack.c.bf16 %v76_v19, %v74_v18  ;;  %v73_v22 = vld [vmem:[#allocation5 + $0x60] sm:$0xff]  ;;  %v75_v23 = vld [vmem:[#allocation5 + $0x70] sm:$0xff]  ;;  %v78_v24 = vld [vmem:[#allocation5 + $0x88] sm:$0xff] }
  0x3d   :  { %v80_v25 = vld [vmem:[#allocation5 + $0x98] sm:$0xff]  ;;  %v77_v26 = vld [vmem:[#allocation5 + $0x80] sm:$0xff]  ;;  %v79_v27 = vld [vmem:[#allocation5 + $0x90] sm:$0xff]  ;;  %v355_v31 = vpack.c.bf16 %v75_v23, %v73_v22 }
  0x3e   :  { %v194_v28 = vld [vmem:[#allocation7 + $0x80] sm:$0xff]  ;;  %v195_v29 = vld [vmem:[#allocation7 + $0x88] sm:$0xff]  ;;  %v196_v34 = vld [vmem:[#allocation7 + $0x90] sm:$0xff]  ;;  %v357_v36 = vpack.c.bf16 %v80_v25, %v78_v24  ;;  %v359_v46 = vpack.c.bf16 %v79_v27, %v77_v26 }
  0x3f   :  { %348 = vmatpush1.bf16.msra.mxu0 %v347_v14  ;;  %v178_v30 = vld [vmem:[#allocation7] sm:$0xff]  ;;  %v373_v32 = vpack.c.bf16 %v195_v29, %v194_v28  ;;  %v179_v33 = vld [vmem:[#allocation7 + $0x8] sm:$0xff]  ;;  %v197_v35 = vld [vmem:[#allocation7 + $0x98] sm:$0xff] }
  0x40   :  { %350 = vmatprep.subr.bf16.mxu0 %v349_v15  ;;  %v375_v37 = vpack.c.bf16 %v179_v33, %v178_v30  ;;  %v377_v38 = vpack.c.bf16 %v197_v35, %v196_v34  ;;  %v180_v39 = vld [vmem:[#allocation7 + $0x10] sm:$0xff]  ;;  %v181_v40 = vld [vmem:[#allocation7 + $0x18] sm:$0xff]  ;;  %v198_v41 = vld [vmem:[#allocation7 + $0xa0] sm:$0xff]  ;;  %v95_v34 = vlaneseq }
  0x41   :  { %v82_v42 = vld [vmem:[#allocation5 + $0xa8] sm:$0xff]  ;;  %v84_v43 = vld [vmem:[#allocation5 + $0xb8] sm:$0xff]  ;;  %374 = vmatprep.subr.bf16.mxu1 %v373_v32  ;;  %v379_v45 = vpack.c.bf16 %v181_v40, %v180_v39  ;;  %v81_v47 = vld [vmem:[#allocation5 + $0xa0] sm:$0xff] }
  0x42   :  { %v199_v44 = vld [vmem:[#allocation7 + $0xa8] sm:$0xff]  ;;  %376 = vmatpush3.bf16.msra.mxu1 %v375_v37  ;;  %v182_v49 = vld [vmem:[#allocation7 + $0x20] sm:$0xff]  ;;  %v361_v51 = vpack.c.bf16 %v84_v43, %v82_v42  ;;  %v83_v52 = vld [vmem:[#allocation5 + $0xb0] sm:$0xff]  ;;  %v96_v35 = vshrl.u32 %v95_v34, 7 }
  0x43   :  { %352 = vmatpush1.bf16.msra.mxu0 %v351_v20  ;;  %378 = vmatprep.subr.bf16.mxu1 %v377_v38  ;;  %v381_v48 = vpack.c.bf16 %v199_v44, %v198_v41  ;;  %v183_v50 = vld [vmem:[#allocation7 + $0x28] sm:$0xff]  ;;  %v200_v53 = vld [vmem:[#allocation7 + $0xb0] sm:$0xff]  ;;  %v201_v54 = vld [vmem:[#allocation7 + $0xb8] sm:$0xff]  ;;  %v363_v58 = vpack.c.bf16 %v83_v52, %v81_v47 }
  0x44   :  { %354 = vmatprep.subr.bf16.mxu0 %v353_v21  ;;  %v86_v55 = vld [vmem:[#allocation5 + $0xc8] sm:$0xff]  ;;  %v88_v56 = vld [vmem:[#allocation5 + $0xd8] sm:$0xff]  ;;  %v383_v57 = vpack.c.bf16 %v183_v50, %v182_v49  ;;  %v85_v59 = vld [vmem:[#allocation5 + $0xc0] sm:$0xff]  ;;  %v385_v60 = vpack.c.bf16 %v201_v54, %v200_v53  ;;  %v101_v38 = vsub.s32 1, %v96_v35 }
  0x45   :  { %v184_v61 = vld [vmem:[#allocation7 + $0x30] sm:$0xff]  ;;  %v185_v62 = vld [vmem:[#allocation7 + $0x38] sm:$0xff]  ;;  %v365_v63 = vpack.c.bf16 %v88_v56, %v86_v55  ;;  %v202_v1 = vld [vmem:[#allocation7 + $0xc0] sm:$0xff] }
  0x46   :  { %380 = vmatpush3.bf16.msra.mxu1 %v379_v45  ;;  %v87_v0 = vld [vmem:[#allocation5 + $0xd0] sm:$0xff]  ;;  %v203_v2 = vld [vmem:[#allocation7 + $0xc8] sm:$0xff]  ;;  %v92_v4 = vld [vmem:[#allocation5 + $0xf8] sm:$0xff]  ;;  %v387_v5 = vpack.c.bf16 %v185_v62, %v184_v61 }
  0x47   :  { %356 = vmatpush1.bf16.msra.mxu0 %v355_v31  ;;  %382 = vmatprep.subr.bf16.mxu1 %v381_v48  ;;  %v90_v3 = vld [vmem:[#allocation5 + $0xe8] sm:$0xff]  ;;  %v367_v6 = vpack.c.bf16 %v87_v0, %v85_v59  ;;  %v89_v7 = vld [vmem:[#allocation5 + $0xe0] sm:$0xff]  ;;  %v389_v8 = vpack.c.bf16 %v203_v2, %v202_v1  ;;  %v91_v12 = vld [vmem:[#allocation5 + $0xf0] sm:$0xff] }
  0x48   :  { %358 = vmatprep.subr.bf16.mxu0 %v357_v36  ;;  %v186_v9 = vld [vmem:[#allocation7 + $0x40] sm:$0xff]  ;;  %v187_v10 = vld [vmem:[#allocation7 + $0x48] sm:$0xff]  ;;  %v369_v11 = vpack.c.bf16 %v92_v4, %v90_v3  ;;  %v204_v13 = vld [vmem:[#allocation7 + $0xd0] sm:$0xff]  ;;  %v371_v16 = vpack.c.bf16 %v91_v12, %v89_v7  ;;  %v97_v36 = vsub.s32 0, %v96_v35 }
  0x49   :  { %v205_v14 = vld [vmem:[#allocation7 + $0xd8] sm:$0xff]  ;;  %v391_v15 = vpack.c.bf16 %v187_v10, %v186_v9  ;;  %v188_v18 = vld [vmem:[#allocation7 + $0x50] sm:$0xff]  ;;  %v206_v20 = vld [vmem:[#allocation7 + $0xe0] sm:$0xff] }
  0x4a   :  { %384 = vmatpush3.bf16.msra.mxu1 %v383_v57  ;;  %v393_v17 = vpack.c.bf16 %v205_v14, %v204_v13  ;;  %v189_v19 = vld [vmem:[#allocation7 + $0x58] sm:$0xff]  ;;  %v207_v21 = vld [vmem:[#allocation7 + $0xe8] sm:$0xff]  ;;  %v190_v25 = vld [vmem:[#allocation7 + $0x60] sm:$0xff] }
  0x4b   :  { %360 = vmatpush1.bf16.msra.mxu0 %v359_v46  ;;  %386 = vmatprep.subr.bf16.mxu1 %v385_v60  ;;  %v395_v22 = vpack.c.bf16 %v189_v19, %v188_v18  ;;  %v60_v23 = vld [vmem:[#allocation2] sm:$0xf]  ;;  %v397_v24 = vpack.c.bf16 %v207_v21, %v206_v20  ;;  %v191_v26 = vld [vmem:[#allocation7 + $0x68] sm:$0xff]  ;;  %v208_v28 = vld [vmem:[#allocation7 + $0xf0] sm:$0xff] }
  0x4c   :  { %362 = vmatprep.subr.bf16.mxu0 %v361_v51  ;;  %v399_v27 = vpack.c.bf16 %v191_v26, %v190_v25  ;;  %v209_v29 = vld [vmem:[#allocation7 + $0xf8] sm:$0xff]  ;;  %v192_v31 = vld [vmem:[#allocation7 + $0x70] sm:$0xff] }
  0x4d   :  { %v401_v30 = vpack.c.bf16 %v209_v29, %v208_v28  ;;  %v193_v32 = vld [vmem:[#allocation7 + $0x78] sm:$0xff] }
  0x4e   :  { %388 = vmatpush3.bf16.msra.mxu1 %v387_v5  ;;  %v403_v33 = vpack.c.bf16 %v193_v32, %v192_v31  ;;  %v93_v37 = vld [vmem:[%s603_s2] sm:$0x3]  ;;  %s295_s2 = sshll.u32 %s516_s9, 4  ;;  %s296_s2 = int_to_ptr.vmem [resolvable:$true] %s295_s2 }
  0x4f   :  { %364 = vmatpush1.bf16.msra.mxu0 %v363_v58  ;;  %390 = vmatprep.subr.bf16.mxu1 %v389_v8  ;;  %v98_v39 = vrot.slane %v93_v37, %v97_v36  ;;  %v102_v40 = vrot.slane %v93_v37, %v101_v38  ;;  %v305_v48 = vld [vmem:[%s605_s4] ss:$0 sm:$0xff]  ;;  %s480_s10 = scalar_lea.vmem %s296_s2, 64  ;;  %p485_p11 = scmp.lt.s32.totalorder %s296_s2, %s296_s2 }
  0x50   :  { %366 = vmatprep.subr.bf16.mxu0 %v365_v63  ;;  %p481_p10 = scmp.ne.s32.totalorder %s296_s2, %s480_s10  ;;  %p486_p12 = scmp.lt.s32.totalorder %s480_s10, %s480_s10 }
  0x52   :  { %392 = vmatpush3.bf16.msra.mxu1 %v391_v15  ;;  %p487_p13 = por %p486_p12, %p485_p11 }
  0x53   :  { %368 = vmatpush1.bf16.msra.mxu0 %v367_v6  ;;  %394 = vmatprep.subr.bf16.mxu1 %v393_v17 }
  0x54   :  { %370 = vmatprep.subr.bf16.mxu0 %v369_v11  ;;  %p488_p0 = pnand %p487_p13, %p481_p10 }
  0x56   :  { %396 = vmatpush3.bf16.msra.mxu1 %v395_v22 }
  0x57   :  { %372 = vmatpush1.bf16.msra.mxu0 %v371_v16  ;;  %398 = vmatprep.subr.bf16.mxu1 %v397_v24 }
  0x5a   :  { %170 = vmatmul.mubr.f32.vlgmr.msra.gmra.mrb[0].mxu0 %v60_v23  ;;  %400 = vmatpush3.bf16.msra.mxu1 %v399_v27 }
  0x5b   :  { %402 = vmatprep.subr.bf16.mxu1 %v401_v30 }
  0x5e   :  { %404 = vmatpush3.bf16.msra.mxu1 %v403_v33 }
 0x12d   :  { %v171_v41 = vpop.f32.mrb[0].mxu0 }
 0x12e   :  { %v172_v42 = vadd.f32 %v171_v41, %v98_v39  ;;  %v173_v43 = vpop.f32.mrb[1].mxu0 }
 0x12f   :  { %v174_v44 = vadd.f32 %v173_v43, %v102_v40 }
 0x130   :  { %v176_v46 = vmax.f32 %v172_v42, 0.0 }
 0x131   :  { %v177_v45 = vmax.f32 %v174_v44, 0.0 }
 0x133   :  { %281 = vmatprep.mubr.f32.mxu1 %v177_v45 }
 0x134   :  { %282 = vmatmul.mubr.f32.vlgmr.msra.gmra.mrb[0].mxu1 %v176_v46 }
 0x207   :  { %v338_v47 = vpop.f32.mrb[0].mxu1 }
 0x208   :  { %v339_v49 = vpop.f32.mrb[1].mxu1 }
 0x209   :  { %v340_v50 = vadd.f32 %v339_v49, %v338_v47 }
 0x20b   :  { %v284_v51 = vadd.f32 %v340_v50, %v305_v48 }
 0x20d   :  { %v287_v52 = vadd.f32 %v284_v51, %v60_v23 }
 0x20f   :  { %288 = vst [vmem:[#allocation8] sm:$0xf] %v287_v52 }
 0x210   :  { %491 = shalt.err (!%p488_p0)
}
 0x211   :  { %s492_s13 = scalar_lea.hbm %s606_s5, 64 }
 0x212   :  { %p493_p1 = scmp.ne.s32.totalorder %s606_s5, %s492_s13  ;;  %p496_p2 = scmp.lt.u32.totalorder %s492_s13, %s606_s5 }
 0x214   :  { %p498_p3 = pnand %p496_p2, %p493_p1 }
 0x216   :  { %501 = shalt.err (!%p498_p3)
}
 0x217   :  { %298 = dma.vmem_to_hbm [thread:$0]  %s296_s2, 64, %s606_s5, [#allocation4]  }
 0x218   :  { %506 = dma.done.wait [#allocation4], 64  }
 0x219   :  { %507 = vsyncadd [#allocation4], 4294967232 }
 0x21a   :  { %302 = vsyncpa [#allocation3], 1 }
 0x21b   :  { %303 = vsyncpa [#allocation6], 1 }
 0x21c   :  { %304 = vsyncpa [#allocation4], 1 }

</bundles_post_ra>
